<compile_context>
chip_gen: v6e
topology: v6e:2x2x1
jax: 0.10.0
libtpu: 0.0.40
codegen_flags: <defaults>
</compile_context>

<pallas_src>
import jax
import jax.numpy as jnp
from jax import lax
from jax.experimental import pallas as pl
from jax.experimental.pallas import tpu as pltpu


_LANE = 128
_SUBLANE = 8
_TARGET_LANE_TILE = 2048            # max lanes per block
_TARGET_BLOCK_BYTES = 1 << 20       # ~1 MiB per streamed array per grid step
_SPLIT_MIN_HALF_BYTES = 256 * 1024  # split for v7x dual-TC only if halves stay >= 256 KiB
_DEFAULT_SCOPED_VMEM = 12 << 20     # stay under v5e's 16 MiB scoped default w/o explicit limit


def _round_up(a, b):
    return (a + b - 1) // b * b


def _pick_lane_tile(hw):
    # Full-extent lane block when it fits (exempt from the 128-divisibility
    # rule, no padding at all); otherwise a multiple of 128 -- the ragged tail
    # block of the pl.cdiv grid is masked by Pallas.
    if hw <= _TARGET_LANE_TILE:
        return hw
    return _TARGET_LANE_TILE


def _maybe_split_for_dual_core(lead_tile, hw_tile, lead_total, hw_total,
                               block_bytes, lead_granularity):
    """Guarantee >=2 grid blocks (v7x has 2 TensorCores) when it is worthwhile."""
    if pl.cdiv(lead_total, lead_tile) * pl.cdiv(hw_total, hw_tile) >= 2:
        return lead_tile, hw_tile
    if block_bytes < 2 * _SPLIT_MIN_HALF_BYTES:
        return lead_tile, hw_tile            # too small: splitting is pure step overhead
    if hw_tile >= 2 * _LANE:
        return lead_tile, _round_up(pl.cdiv(hw_tile, 2), _LANE)
    if lead_tile >= 2 * lead_granularity:
        return _round_up(pl.cdiv(lead_tile, 2), lead_granularity), hw_tile
    return lead_tile, hw_tile


def _compiler_params(step_bytes):
    """dimension_semantics + a VMEM limit computed from actual need.

    step_bytes = per-grid-step block bytes summed over all streamed arrays.
    Double-buffering needs ~2x that; only claim more than the scoped default
    (16 MiB v5e / 32 MiB v6e,v7x; v7x physical VMEM is 64 MiB) when the tiles
    genuinely require it -- with ~1 MiB blocks they never do.
    """
    kwargs = dict(dimension_semantics=("parallel", "parallel"))
    need = 2 * step_bytes + (1 << 20)        # 2 pipeline buffers + slack
    if need > _DEFAULT_SCOPED_VMEM:
        kwargs["vmem_limit_bytes"] = min(need * 3 // 2, 56 << 20)
    return pltpu.CompilerParams(**kwargs)


# ----------------------------- kernels --------------------------------------


def _add_kernel(x_ref, idn_ref, o_ref):
    # (row_tile, hw_tile) lane-dense elementwise residual add.
    o_ref[...] = x_ref[...] + idn_ref[...]


def _conv_bn_add_kernel(x_ref, idn_ref, w_ref, shift_ref, o_ref):
    # x_ref:     (n_blk, C_out, hw_tile)  residual input tile
    # idn_ref:   (n_blk, C_in,  hw_tile)  identity tile (1x1-conv input)
    # w_ref:     (C_out, C_in)            conv weight with BN scale folded in (f32)
    # shift_ref: (C_out, 1)               folded BN shift (f32)
    n_blk = x_ref.shape[0]
    c_out, c_in = w_ref.shape
    idn = idn_ref[...].astype(jnp.float32)
    w = jnp.broadcast_to(w_ref[...][None], (n_blk, c_out, c_in))
    # Batched matmul: (n_blk, C_out, C_in) @ (n_blk, C_in, hw) -> (n_blk, C_out, hw).
    y = lax.dot_general(
        w, idn,
        dimension_numbers=(((2,), (1,)), ((0,), (0,))),
        preferred_element_type=jnp.float32)
    o_ref[...] = (x_ref[...].astype(jnp.float32) + y
                  + shift_ref[...][None, :, :]).astype(o_ref.dtype)


# --------------------------- pallas wrappers ---------------------------------


def _shortcut_add(x2, id2):
    # x2, id2: (R, HW) with R = N * C  (free reshape on contiguous NCHW).
    R, HW = x2.shape
    dsize = x2.dtype.itemsize
    hw_tile = _pick_lane_tile(HW)
    target_rows = max(_SUBLANE, _TARGET_BLOCK_BYTES // max(1, hw_tile * dsize))
    if R <= target_rows:
        row_tile = R                          # full dim: exempt from sublane-8 rule
    else:
        row_tile = max(_SUBLANE, target_rows // _SUBLANE * _SUBLANE)
    row_tile, hw_tile = _maybe_split_for_dual_core(
        row_tile, hw_tile, R, HW, row_tile * hw_tile * dsize, _SUBLANE)
    grid = (pl.cdiv(R, row_tile), pl.cdiv(HW, hw_tile))
    step_bytes = 3 * row_tile * hw_tile * dsize   # x + identity + out per step

    return pl.pallas_call(
        _add_kernel,
        out_shape=jax.ShapeDtypeStruct((R, HW), x2.dtype),
        grid_spec=pltpu.PrefetchScalarGridSpec(
            num_scalar_prefetch=0,
            grid=grid,
            in_specs=[
                pl.BlockSpec((row_tile, hw_tile), lambda i, j: (i, j)),
                pl.BlockSpec((row_tile, hw_tile), lambda i, j: (i, j)),
            ],
            out_specs=pl.BlockSpec((row_tile, hw_tile), lambda i, j: (i, j)),
        ),
        compiler_params=_compiler_params(step_bytes),
    )(x2, id2)


def _shortcut_conv_bn_add(x3, id3, w_folded, shift):
    # x3: (N, C_out, HW); id3: (N, C_in, HW); w_folded: (C_out, C_in); shift: (C_out, 1)
    N, C_out, HW = x3.shape
    C_in = id3.shape[1]
    dsize = x3.dtype.itemsize
    id_dsize = id3.dtype.itemsize
    hw_tile = _pick_lane_tile(HW)
    c_max = max(C_out, C_in)
    n_blk = max(1, min(N, _TARGET_BLOCK_BYTES // max(1, c_max * hw_tile * dsize)))
    n_blk, hw_tile = _maybe_split_for_dual_core(
        n_blk, hw_tile, N, HW, n_blk * c_max * hw_tile * dsize, 1)
    grid = (pl.cdiv(N, n_blk), pl.cdiv(HW, hw_tile))
    step_bytes = (n_blk * hw_tile * (2 * C_out * dsize + C_in * id_dsize)
                  + (C_out * C_in + C_out) * 4)

    return pl.pallas_call(
        _conv_bn_add_kernel,
        out_shape=jax.ShapeDtypeStruct((N, C_out, HW), x3.dtype),
        grid_spec=pltpu.PrefetchScalarGridSpec(
            num_scalar_prefetch=0,
            grid=grid,
            in_specs=[
                pl.BlockSpec((n_blk, C_out, hw_tile), lambda i, j: (i, 0, j)),  # x
                pl.BlockSpec((n_blk, C_in, hw_tile), lambda i, j: (i, 0, j)),   # identity
                pl.BlockSpec((C_out, C_in), lambda i, j: (0, 0)),               # folded weight
                pl.BlockSpec((C_out, 1), lambda i, j: (0, 0)),                  # folded BN shift
            ],
            out_specs=pl.BlockSpec((n_blk, C_out, hw_tile), lambda i, j: (i, 0, j)),
        ),
        compiler_params=_compiler_params(step_bytes),
    )(x3, id3, w_folded, shift)


def shortcut_forward(x, identity, params, stride, eps=1e-5):
    """Forward of Shortcut.

    x:        (N, C_out, H, W)  -- `input` in the PyTorch module
    identity: (N, C_in,  H, W)  -- the popped skip tensor
    params:   None (identity shortcut, in_planes == out_planes) or a dict with
              conv weight (C_out, C_in, 1, 1) and BatchNorm2d params.
    """
    if stride != 1:
        return x                    # out = input, shortcut branch never evaluated

    N, C_out, H, W = x.shape
    C_in = identity.shape[1]
    HW = H * W

    if params is None:
        # in_planes == out_planes: shortcut is nn.Sequential() -> plain add.
        # (Inside a fused model this add is best left to XLA so it fuses into
        #  x's producer; the Pallas path is kept for the standalone module.)
        out2 = _shortcut_add(x.reshape(N * C_out, HW),
                             identity.reshape(N * C_in, HW))
        return out2.reshape(N, C_out, H, W)

    w = params["conv_w"]            # (C_out, C_in, 1, 1)
    gamma = params["bn_gamma"]      # (C_out,)
    beta = params["bn_beta"]
    r_mean = params["bn_mean"]
    r_var = params["bn_var"]

    # TODO(synk): BatchNorm is folded with inference (running-stats) semantics;
    # training-mode per-batch statistics are not reproduced.
    scale = gamma.astype(jnp.float32) / jnp.sqrt(r_var.astype(jnp.float32) + eps)
    shift = (beta.astype(jnp.float32)
             - r_mean.astype(jnp.float32) * scale).reshape(C_out, 1)
    w_folded = w.reshape(C_out, C_in).astype(jnp.float32) * scale[:, None]

    # TODO(synk): for deep layers with HW < 128 and C >= 128 a channels-on-lanes
    # layout ((hw, C_in) @ (C_in, C_out)) would avoid masked lane stores; the
    # spatial-on-lanes layout is kept here for simplicity.
    out3 = _shortcut_conv_bn_add(x.reshape(N, C_out, HW),
                                 identity.reshape(N, C_in, HW),
                                 w_folded, shift)
    return out3.reshape(N, C_out, H, W)


# ------------------------------- reference -----------------------------------


def _reference_forward(x, identity, params, stride, eps=1e-5):
    if stride != 1:
        return x
    if params is None:
        return x + identity
    C_out, C_in = params["conv_w"].shape[:2]
    w = params["conv_w"].reshape(C_out, C_in).astype(jnp.float32)
    y = jnp.einsum("oi,nihw->nohw", w, identity.astype(jnp.float32))
    scale = params["bn_gamma"] / jnp.sqrt(params["bn_var"] + eps)
    shift = params["bn_beta"] - params["bn_mean"] * scale
    y = y * scale[None, :, None, None] + shift[None, :, None, None]
    return x.astype(jnp.float32) + y


if __name__ == "__main__":
    key = jax.random.PRNGKey(0)
    k = jax.random.split(key, 9)

    def make_params(kw, c_in, c_out):
        return {
            "conv_w": 0.1 * jax.random.normal(kw, (c_out, c_in, 1, 1), jnp.float32),
            "bn_gamma": 1.1 * jnp.ones((c_out,), jnp.float32),
            "bn_beta": 0.05 * jnp.ones((c_out,), jnp.float32),
            "bn_mean": 0.02 * jnp.ones((c_out,), jnp.float32),
            "bn_var": 0.9 * jnp.ones((c_out,), jnp.float32),
        }

    # 1) Conv1x1 + BN + add (in_planes != out_planes), f32.
    N, c_in, c_out, H, W = 2, 4, 8, 16, 16
    x = jax.random.normal(k[0], (N, c_out, H, W), jnp.float32)
    idn = jax.random.normal(k[1], (N, c_in, H, W), jnp.float32)
    params = make_params(k[2], c_in, c_out)
    out = jax.block_until_ready(shortcut_forward(x, idn, params, stride=1))
    ref = _reference_forward(x, idn, params, 1)
    assert out.shape == (N, c_out, H, W)
    assert jnp.allclose(out, ref, atol=1e-5, rtol=1e-5), "conv+bn+add f32 mismatch"

    # 2) Plain add (in_planes == out_planes), f32.
    x2 = jax.random.normal(k[3], (N, c_out, H, W), jnp.float32)
    idn2 = jax.random.normal(k[4], (N, c_out, H, W), jnp.float32)
    out2 = jax.block_until_ready(shortcut_forward(x2, idn2, None, stride=1))
    assert jnp.allclose(out2, x2 + idn2, atol=1e-6, rtol=1e-6), "add mismatch"

    # 3) stride != 1 -> passthrough of input.
    out3 = shortcut_forward(x, idn, params, stride=2)
    assert jnp.allclose(out3, x), "stride!=1 passthrough mismatch"

    # 4) MobileNet-style non-128-multiple spatial size (14x14): full-HW lane
    #    block, no padding anywhere.
    x4 = jax.random.normal(k[5], (N, c_out, 14, 14), jnp.float32)
    idn4 = jax.random.normal(k[6], (N, c_in, 14, 14), jnp.float32)
    out4 = jax.block_until_ready(shortcut_forward(x4, idn4, params, stride=1))
    ref4 = _reference_forward(x4, idn4, params, 1)
    assert jnp.allclose(out4, ref4, atol=1e-5, rtol=1e-5), "14x14 conv mismatch"

    # 5) Spatial size larger than one lane tile with a ragged tail
    #    (HW = 48*48 = 2304 > 2048): Pallas-masked edge block, no padding.
    x5 = jax.random.normal(k[7], (N, c_out, 48, 48), jnp.float32)
    idn5 = jax.random.normal(k[8], (N, c_out, 48, 48), jnp.float32)
    out5 = jax.block_until_ready(shortcut_forward(x5, idn5, None, stride=1))
    assert jnp.allclose(out5, x5 + idn5, atol=1e-6, rtol=1e-6), "ragged add mismatch"

    # 6) bf16 activation path (half the HBM traffic; f32 accumulation in-kernel).
    xb = x.astype(jnp.bfloat16)
    idb = idn.astype(jnp.bfloat16)
    outb = jax.block_until_ready(shortcut_forward(xb, idb, params, stride=1))
    refb = _reference_forward(xb.astype(jnp.float32), idb.astype(jnp.float32), params, 1)
    assert outb.dtype == jnp.bfloat16
    assert jnp.allclose(outb.astype(jnp.float32), refb, atol=5e-2, rtol=5e-2), "bf16 mismatch"

    print("KERNEL_OK")
</pallas_src>

<mosaic_0001>
module attributes {stable_mosaic.version = 11 : i64} {
  func.func @_conv_bn_add_kernel(%arg0: i32, %arg1: i32, %arg2: memref<2x8x256xf32, #tpu.memory_space<vmem>>, %arg3: memref<2x4x256xf32, #tpu.memory_space<vmem>>, %arg4: memref<8x4xf32, #tpu.memory_space<vmem>>, %arg5: memref<8x1xf32, #tpu.memory_space<vmem>>, %arg6: memref<2x8x256xf32, #tpu.memory_space<vmem>>) attributes {dimension_semantics = [#tpu.dimension_semantics<parallel>, #tpu.dimension_semantics<parallel>], iteration_bounds = array<i64: 1, 1>, scalar_prefetch = 0 : i64, scratch_operands = 0 : i64, tpu.core_type = #tpu.core_type<tc>, window_params = [{transform_indices = @transform_0, window_bounds = array<i64: 2, 8, 256>}, {transform_indices = @transform_1, window_bounds = array<i64: 2, 4, 256>}, {pipeline_mode = #tpu.pipeline_mode<synchronous>, transform_indices = @transform_2, window_bounds = array<i64: 8, 4>}, {pipeline_mode = #tpu.pipeline_mode<synchronous>, transform_indices = @transform_3, window_bounds = array<i64: 8, 1>}, {transform_indices = @transform_4, window_bounds = array<i64: 2, 8, 256>}]} {
    %c0 = arith.constant 0 : index
    %c0_0 = arith.constant 0 : index
    %c0_1 = arith.constant 0 : index
    %0 = vector.load %arg3[%c0, %c0_0, %c0_1] : memref<2x4x256xf32, #tpu.memory_space<vmem>>, vector<2x4x256xf32>
    %c0_2 = arith.constant 0 : index
    %c0_3 = arith.constant 0 : index
    %1 = vector.load %arg4[%c0_2, %c0_3] : memref<8x4xf32, #tpu.memory_space<vmem>>, vector<8x4xf32>
    %2 = vector.shape_cast %1 : vector<8x4xf32> to vector<1x8x4xf32>
    %3 = vector.shape_cast %2 : vector<1x8x4xf32> to vector<1x8x4xf32>
    %4 = vector.broadcast %3 : vector<1x8x4xf32> to vector<2x8x4xf32>
    %cst = arith.constant dense<0.000000e+00> : vector<2x8x256xf32>
    %5 = tpu.matmul %4, %0, %cst {dimension_numbers = #tpu.dot_dimension_numbers<[2], [1], [1], [2], [0, 0, 0, 1, 1, 2], [0], [0]>} : vector<2x8x4xf32>, vector<2x4x256xf32>, vector<2x8x256xf32> -> vector<2x8x256xf32>
    %c0_4 = arith.constant 0 : index
    %c0_5 = arith.constant 0 : index
    %c0_6 = arith.constant 0 : index
    %6 = vector.load %arg2[%c0_4, %c0_5, %c0_6] : memref<2x8x256xf32, #tpu.memory_space<vmem>>, vector<2x8x256xf32>
    %7 = arith.addf %6, %5 : vector<2x8x256xf32>
    %c0_7 = arith.constant 0 : index
    %c0_8 = arith.constant 0 : index
    %8 = vector.load %arg5[%c0_7, %c0_8] : memref<8x1xf32, #tpu.memory_space<vmem>>, vector<8x1xf32>
    %9 = vector.shape_cast %8 : vector<8x1xf32> to vector<1x8x1xf32>
    %10 = vector.broadcast %9 : vector<1x8x1xf32> to vector<2x8x256xf32>
    %11 = arith.addf %7, %10 : vector<2x8x256xf32>
    %c0_9 = arith.constant 0 : index
    %c0_10 = arith.constant 0 : index
    %c0_11 = arith.constant 0 : index
    %12 = vector.load %arg6[%c0_9, %c0_10, %c0_11] : memref<2x8x256xf32, #tpu.memory_space<vmem>>, vector<2x8x256xf32>
    tpu.vector_store %arg6[%c0_9, %c0_10, %c0_11], %11 {strides = array<i32>} : memref<2x8x256xf32, #tpu.memory_space<vmem>>, vector<2x8x256xf32>,
    return
  }
  func.func @transform_0(%arg0: i32, %arg1: i32) -> (i32, i32, i32) {
    %c0_i32 = arith.constant 0 : i32
    %c0_i32_0 = arith.constant 0 : i32
    return %arg0, %c0_i32, %arg1 : i32, i32, i32
  }
  func.func @transform_1(%arg0: i32, %arg1: i32) -> (i32, i32, i32) {
    %c0_i32 = arith.constant 0 : i32
    %c0_i32_0 = arith.constant 0 : i32
    return %arg0, %c0_i32, %arg1 : i32, i32, i32
  }
  func.func @transform_2(%arg0: i32, %arg1: i32) -> (i32, i32) {
    %c0_i32 = arith.constant 0 : i32
    %c0_i32_0 = arith.constant 0 : i32
    %c0_i32_1 = arith.constant 0 : i32
    return %c0_i32, %c0_i32_0 : i32, i32
  }
  func.func @transform_3(%arg0: i32, %arg1: i32) -> (i32, i32) {
    %c0_i32 = arith.constant 0 : i32
    %c0_i32_0 = arith.constant 0 : i32
    %c0_i32_1 = arith.constant 0 : i32
    return %c0_i32, %c0_i32_0 : i32, i32
  }
  func.func @transform_4(%arg0: i32, %arg1: i32) -> (i32, i32, i32) {
    %c0_i32 = arith.constant 0 : i32
    %c0_i32_0 = arith.constant 0 : i32
    return %arg0, %c0_i32, %arg1 : i32, i32, i32
  }
}

</mosaic_0001>

<bundles_post_ra>
// kernel: tpu_custom_call.1
= control target key start
LH: loop header
LB: loop body
LE: loop exit
PB: predicated region body
PF: predicated region fallthrough
CT: control target
= control target key end

     0   :  { %9 = vsyncpa [#allocation3], 0  ;;  %s347_s0 = inlined_call_operand.hbm [shape: f32[2,8,256], index: 0, kind: input, shape index: {}]   ;;  %s348_s1 = inlined_call_operand.vmem [shape: f32[2,4,256], index: 1, kind: input, shape index: {}]   ;;  %s349_s2 = inlined_call_operand.vmem [shape: f32[8,4], index: 2, kind: input, shape index: {}]   ;;  %s350_s3 = inlined_call_operand.vmem [shape: f32[8,1], index: 3, kind: input, shape index: {}]   ;;  %s351_s4 = inlined_call_operand.hbm [shape: f32[2,8,256], index: 4, kind: output, shape index: {}]  }
   0x1   :  { %10 = vsyncpa [#allocation4], 0  ;;  %s292_s15 = smov [#allocation2]  }
   0x2   :  { %s16_s16 = sshll.u32 %s292_s15, 4  ;;  %s17_s16 = int_to_ptr.vmem [resolvable:$true] %s16_s16 }
   0x3   :  { %s256_s17 = scalar_lea.vmem %s17_s16, 512  ;;  %p261_p1 = scmp.lt.s32.totalorder %s17_s16, %s17_s16 }
   0x4   :  { %p257_p0 = scmp.ne.s32.totalorder %s17_s16, %s256_s17  ;;  %p262_p2 = scmp.lt.s32.totalorder %s256_s17, %s256_s17 }
   0x6   :  { %p263_p3 = por %p262_p2, %p261_p1 }
   0x8   :  { %p264_p4 = pnand %p263_p3, %p257_p0 }
   0xa   :  { %267 = shalt.err (!%p264_p4)
}
   0xb   :  { %s293_s18 = smov 256   ;;  %s294_s19 = smov 16  }
   0xc   :  { %22 = dma.hbm_to_vmem [thread:$0]  %s347_s0, 512, %s17_s16, [#allocation3], %s293_s18, %s293_s18, %s294_s19  }
   0xd   :  { %288 = dma.done.wait [#allocation3], 512  }
   0xe   :  { %289 = vsyncadd [#allocation3], 4294966784  ;;  %v295_v0 = vmov 0.0   ;;  %v296_v1 = vmov 0   ;;  %v32_v2 = vld [vmem:[%s348_s1] sm:$0xff]  ;;  %vm41_vm0 = vcmask 1043456  }
   0xf   :  { %110 = vmatprep.mubr.f32.mxu0 %v295_v0  ;;  %187 = vmatprep.mubr.f32.mxu1 %v295_v0  ;;  %v33_v3 = vld [vmem:[%s348_s1 + $0x8] sm:$0xff]  ;;  %v36_v4 = vcombine.high %v32_v2, %v32_v2  ;;  %v202_v6 = vld [vmem:[%s350_s3] sm:$0xff]  ;;  %vm37_vm1 = vcmask 31744   ;;  %v196_v9 = vld [vmem:[#allocation2 + $0x10] sm:$0xff]  ;;  %s297_s1 = smov [#allocation5]  }
  0x10   :  { %245 = vset.pattern.permute.xlu0 %v296_v1  ;;  %v118_v5 = vcombine.high %v33_v3, %v33_v3  ;;  %v34_v7 = vld [vmem:[%s349_s2] sm:$0xff]  ;;  %v195_v13 = vld [vmem:[#allocation2 + $0x8] sm:$0xff]  ;;  %v197_v14 = vld [vmem:[#allocation2 + $0x18] sm:$0xff]  ;;  %s221_s2 = sshll.u32 %s297_s1, 4  ;;  %s222_s2 = int_to_ptr.vmem [resolvable:$true] %s221_s2 }
  0x11   :  { %205 = vperm.xlu0 %245, %v202_v6   ;;  %233 = vmatprep.subr.msk.mxu0 %vm41_vm0, %v36_v4  ;;  %v194_v8 = vld [vmem:[#allocation2] sm:$0xff]  ;;  %s268_s3 = scalar_lea.vmem %s222_s2, 512  ;;  %p273_p6 = scmp.lt.s32.totalorder %s222_s2, %s222_s2 }
  0x12   :  { %236 = vmatprep.subr.msk.mxu1 %vm41_vm0, %v118_v5  ;;  %234 = vmatpush1.msk.msra.mxu0 %vm41_vm0, %v32_v2  ;;  %p269_p5 = scmp.ne.s32.totalorder %s222_s2, %s268_s3  ;;  %p274_p7 = scmp.lt.s32.totalorder %s268_s3, %s268_s3 }
  0x13   :  { %237 = vmatpush1.msk.msra.mxu1 %vm41_vm0, %v33_v3  ;;  %235 = vmatmul.mubr.msk.f32.vlgmr.msra.gmra.mxu0 %vm37_vm1, %v34_v7 }
  0x14   :  { %238 = vmatmul.mubr.msk.f32.vlgmr.msra.gmra.mxu1 %vm37_vm1, %v34_v7  ;;  %p275_p8 = por %p274_p7, %p273_p6 }
  0x16   :  { %p276_p9 = pnand %p275_p8, %p269_p5 }
  0x8c   :  { %v206_v10 = vpop.permute.xlu0 %205 }
  0xd3   :  { %v112_v11 = vpop.f32.mrf.mxu0 }
  0xd4   :  { %v189_v12 = vpop.f32.mrf.mxu1  ;;  %v198_v15 = vadd.f32 %v194_v8, %v112_v11 }
  0xd5   :  { %v200_v16 = vadd.f32 %v196_v9, %v189_v12  ;;  %v114_v17 = vpop.f32.mrf.mxu0 }
  0xd6   :  { %v191_v18 = vpop.f32.mrf.mxu1  ;;  %v208_v19 = vadd.f32 %v206_v10, %v198_v15  ;;  %v199_v21 = vadd.f32 %v195_v13, %v114_v17 }
  0xd7   :  { %v210_v20 = vadd.f32 %v206_v10, %v200_v16  ;;  %v201_v22 = vadd.f32 %v197_v14, %v191_v18 }
  0xd8   :  { %212 = vst [vmem:[#allocation5] sm:$0xff] %v208_v19  ;;  %v209_v23 = vadd.f32 %v206_v10, %v199_v21 }
  0xd9   :  { %214 = vst [vmem:[#allocation5 + $0x10] sm:$0xff] %v210_v20  ;;  %v211_v24 = vadd.f32 %v206_v10, %v201_v22 }
  0xda   :  { %213 = vst [vmem:[#allocation5 + $0x8] sm:$0xff] %v209_v23 }
  0xdb   :  { %215 = vst [vmem:[#allocation5 + $0x18] sm:$0xff] %v211_v24 }
  0xdc   :  { %279 = shalt.err (!%p276_p9)
}
  0xdd   :  { %227 = dma.vmem_to_hbm [thread:$0]  %s222_s2, 512, %s351_s4, [#allocation4], %s293_s18, %s293_s18, %s294_s19  }
  0xde   :  { %290 = dma.done.wait [#allocation4], 512  }
  0xdf   :  { %291 = vsyncadd [#allocation4], 4294966784 }
  0xe0   :  { %231 = vsyncpa [#allocation3], 1 }
  0xe1   :  { %232 = vsyncpa [#allocation4], 1 }

</bundles_post_ra>
